<compile_context>
chip_gen: v7x
topology: tpu7x:2x2x1
jax: 0.10.0
libtpu: 0.0.40
codegen_flags: <defaults>
</compile_context>

<pallas_src>
import functools

import jax
import jax.numpy as jnp
from jax import lax
from jax.experimental import pallas as pl
from jax.experimental.pallas import tpu as pltpu


def _round_up(x, n):
    return ((x + n - 1) // n) * n


def _vmem_budget():
    """(vmem_limit_bytes, tile_budget_bytes) for the current TPU generation."""
    phys = 64 * 1024 * 1024  # conservative default = v7x per-TC VMEM
    try:
        info = pltpu.get_tpu_info()
        for name in ("vmem_capacity_bytes", "vmem_bytes", "vmem_size_bytes"):
            v = getattr(info, name, None)
            if v:
                phys = int(v)
                break
    except Exception:
        pass
    vmem_limit = min((phys * 3) // 4, 96 * 1024 * 1024)  # 96MiB v5e/v6e, 48MiB v7x
    tile_budget = (vmem_limit * 7) // 10                 # headroom for scratch/temps
    return vmem_limit, tile_budget


def _choose_tile_m(m, d, w_dtype, tile_budget):
    """Largest M-tile whose double-buffered footprint fits the VMEM budget."""
    w_itemsize = jnp.dtype(w_dtype).itemsize
    sub = max(8, 32 // w_itemsize)          # 8 f32, 16 bf16, 32 int8/fp8 sublanes
    # Per-row VMEM: 2x W buffers + 2x lane-padded (tm,1) target buffers
    # + ~4x (tm,1)-padded f32 temporaries (row, residual, square, iota).
    per_row = 2 * d * w_itemsize + 6 * 128 * 4
    tm = max(sub, (tile_budget // per_row) // sub * sub)
    return min(tm, _round_up(m, sub))


def _wls_cost_kernel(w_ref, p_ref, t_ref, o_ref, *, tile_m, m_total):
    """One M-tile partial of cost = sum((W @ p - t)^2), written to o_ref."""
    i = pl.program_id(0)

    # MXU N=1 matvec: (tm, D) @ (D, 1) -> (tm, 1), f32 accumulation.
    # W stays in its native dtype (no in-VMEM f32 upcast).
    row = jnp.dot(w_ref[...], p_ref[...], preferred_element_type=jnp.float32)
    r = row - t_ref[...]

    # Mask rows past M in the last (partial) tile.  Select (not multiply) so
    # Inf/NaN padding garbage cannot leak into the sum.  Static no-op when M
    # divides the tile size.
    if m_total % tile_m != 0:
        ids = lax.broadcasted_iota(jnp.int32, r.shape, 0) + i * tile_m
        r = jnp.where(ids < m_total, r, 0.0)

    o_ref[...] = jnp.sum(r * r, keepdims=True)   # (1, 1) per-tile partial


def pallas_quadratic_cost(params, w, target, tile_m=None):
    """cost = sum((W @ params - target)^2) via an M-tiled Pallas TPU kernel."""
    m, d = w.shape
    p2 = params.reshape(d, 1).astype(w.dtype)     # (D,1) feeds the MXU directly
    t2 = target.reshape(m, 1).astype(jnp.float32)
    w_itemsize = jnp.dtype(w.dtype).itemsize

    vmem_limit, tile_budget = _vmem_budget()
    tm = tile_m if tile_m is not None else _choose_tile_m(m, d, w.dtype, tile_budget)
    num_tiles = pl.cdiv(m, tm)

    kernel = functools.partial(_wls_cost_kernel, tile_m=tm, m_total=m)

    partials = pl.pallas_call(
        kernel,
        out_shape=jax.ShapeDtypeStruct((num_tiles, 1), jnp.float32),
        grid=(num_tiles,),
        in_specs=[
            pl.BlockSpec((tm, d), lambda i: (i, 0)),   # W   (M, D), streamed
            pl.BlockSpec((d, 1), lambda i: (0, 0)),    # p   (D, 1), resident
            pl.BlockSpec((tm, 1), lambda i: (i, 0)),   # t   (M, 1), streamed
        ],
        # Per-tile partial sums: no cross-step dependence -> grid axis can be
        # 'parallel' (v7x: M split across both TensorCores; no-op on v5e/v6e).
        out_specs=pl.BlockSpec((1, 1), lambda i: (i, 0)),
        compiler_params=pltpu.CompilerParams(
            dimension_semantics=("parallel",),
            vmem_limit_bytes=int(vmem_limit)),
        cost_estimate=pl.CostEstimate(
            flops=2 * m * d + 3 * m,
            transcendentals=0,
            bytes_accessed=m * d * w_itemsize + 4 * (m + d + num_tiles)),
    )(w, p2, t2)

    # Final tiny reduction over tile partials (pairwise/tiled summation).
    return jnp.sum(partials)


class TorchInterfacePallas:
    """JAX/Pallas analog of `_torch_interface`.

    __init__(func, paras_init, args) stores the cost function, the parameter
    vector (the nn.Parameter equivalent) and extra args; forward() evaluates
    cost = func(params, *args).
    """

    def __init__(self, func, paras_init, args):
        self._func1 = func
        self._args1 = args
        self._th_params = paras_init  # "parameter" tensor

    def forward(self):
        return self._func1(self._th_params, *self._args1)


if __name__ == "__main__":
    # Small, deterministic shapes: D = 32 parameters, M = 64 observations.
    D, M = 32, 64
    key = jax.random.PRNGKey(0)
    k_p, k_w, k_t = jax.random.split(key, 3)

    paras_init = jax.random.normal(k_p, (D,), dtype=jnp.float32)
    W = jax.random.normal(k_w, (M, D), dtype=jnp.float32) / jnp.sqrt(D)
    target = jax.random.normal(k_t, (M,), dtype=jnp.float32)

    module = TorchInterfacePallas(pallas_quadratic_cost, paras_init, (W, target))
    cost = jax.block_until_ready(module.forward())

    # Pure-JAX reference for correctness.
    ref = jnp.sum((W @ paras_init - target) ** 2)
    assert jnp.allclose(cost, ref, rtol=1e-5, atol=1e-5), (cost, ref)

    # Second check: multi-tile 'parallel' grid + masked last tile
    # (M not a multiple of TM), partials reduced in the wrapper.
    M2, D2 = 333, 64
    k_p2, k_w2, k_t2 = jax.random.split(jax.random.PRNGKey(1), 3)
    p2 = jax.random.normal(k_p2, (D2,), dtype=jnp.float32)
    W2 = jax.random.normal(k_w2, (M2, D2), dtype=jnp.float32) / jnp.sqrt(D2)
    t2 = jax.random.normal(k_t2, (M2,), dtype=jnp.float32)
    cost2 = jax.block_until_ready(
        pallas_quadratic_cost(p2, W2, t2, tile_m=128))
    ref2 = jnp.sum((W2 @ p2 - t2) ** 2)
    assert jnp.allclose(cost2, ref2, rtol=1e-4, atol=1e-4), (cost2, ref2)

    print("KERNEL_OK")
</pallas_src>

<mosaic_0001>
module attributes {stable_mosaic.version = 11 : i64} {
  func.func @_wls_cost_kernel(%arg0: i32, %arg1: memref<64x32xf32, #tpu.memory_space<vmem>>, %arg2: memref<32x1xf32, #tpu.memory_space<vmem>>, %arg3: memref<64x1xf32, #tpu.memory_space<vmem>>, %arg4: memref<1x1xf32, #tpu.memory_space<vmem>>) attributes {dimension_semantics = [#tpu.dimension_semantics<parallel>], iteration_bounds = array<i64: 1>, scalar_prefetch = 0 : i64, scratch_operands = 0 : i64, tpu.core_type = #tpu.core_type<tc>, window_params = [{transform_indices = @transform_0, window_bounds = array<i64: 64, 32>}, {pipeline_mode = #tpu.pipeline_mode<synchronous>, transform_indices = @transform_1, window_bounds = array<i64: 32, 1>}, {transform_indices = @transform_2, window_bounds = array<i64: 64, 1>}, {transform_indices = @transform_3, window_bounds = array<i64: 1, 1>}]} {
    %c0 = arith.constant 0 : index
    %c0_0 = arith.constant 0 : index
    %0 = vector.load %arg1[%c0, %c0_0] : memref<64x32xf32, #tpu.memory_space<vmem>>, vector<64x32xf32>
    %c0_1 = arith.constant 0 : index
    %c0_2 = arith.constant 0 : index
    %1 = vector.load %arg2[%c0_1, %c0_2] : memref<32x1xf32, #tpu.memory_space<vmem>>, vector<32x1xf32>
    %cst = arith.constant dense<0.000000e+00> : vector<64x1xf32>
    %2 = tpu.matmul %0, %1, %cst {dimension_numbers = #tpu.dot_dimension_numbers<[1], [0], [0], [1], [0, 0, 1, 1], [], []>} : vector<64x32xf32>, vector<32x1xf32>, vector<64x1xf32> -> vector<64x1xf32>
    %c0_3 = arith.constant 0 : index
    %c0_4 = arith.constant 0 : index
    %3 = vector.load %arg3[%c0_3, %c0_4] : memref<64x1xf32, #tpu.memory_space<vmem>>, vector<64x1xf32>
    %4 = arith.subf %2, %3 : vector<64x1xf32>
    %5 = arith.mulf %4, %4 : vector<64x1xf32>
    %6 = vector.shape_cast %5 : vector<64x1xf32> to vector<1x64x1xf32>
    %cst_5 = arith.constant dense<0.000000e+00> : vector<1xf32>
    %7 = vector.multi_reduction <add>, %6, %cst_5 [1, 2] : vector<1x64x1xf32> to vector<1xf32>
    %8 = vector.shape_cast %7 : vector<1xf32> to vector<1x1x1xf32>
    %9 = vector.extract %8[0, 0, 0] : f32 from vector<1x1x1xf32>
    %10 = vector.broadcast %9 : f32 to vector<1x1xf32>
    %c0_6 = arith.constant 0 : index
    %c0_7 = arith.constant 0 : index
    %11 = vector.load %arg4[%c0_6, %c0_7] : memref<1x1xf32, #tpu.memory_space<vmem>>, vector<1x1xf32>
    tpu.vector_store %arg4[%c0_6, %c0_7], %10 {strides = array<i32>} : memref<1x1xf32, #tpu.memory_space<vmem>>, vector<1x1xf32>,
    return
  }
  func.func @transform_0(%arg0: i32) -> (i32, i32) {
    %c0_i32 = arith.constant 0 : i32
    %c0_i32_0 = arith.constant 0 : i32
    return %arg0, %c0_i32 : i32, i32
  }
  func.func @transform_1(%arg0: i32) -> (i32, i32) {
    %c0_i32 = arith.constant 0 : i32
    %c0_i32_0 = arith.constant 0 : i32
    %c0_i32_1 = arith.constant 0 : i32
    return %c0_i32, %c0_i32_0 : i32, i32
  }
  func.func @transform_2(%arg0: i32) -> (i32, i32) {
    %c0_i32 = arith.constant 0 : i32
    %c0_i32_0 = arith.constant 0 : i32
    return %arg0, %c0_i32 : i32, i32
  }
  func.func @transform_3(%arg0: i32) -> (i32, i32) {
    %c0_i32 = arith.constant 0 : i32
    %c0_i32_0 = arith.constant 0 : i32
    return %arg0, %c0_i32 : i32, i32
  }
}

</mosaic_0001>

<bundles_post_ra>
// kernel: tpu_custom_call.1
= control target key start
LH: loop header
LB: loop body
LE: loop exit
PB: predicated region body
PF: predicated region fallthrough
CT: control target
= control target key end

     0   :  { %vm27_vm0 = vcmask 261120   ;;  %s411_s0 = inlined_call_operand.vmem [shape: f32[64,32], index: 0, kind: input, shape index: {}]   ;;  %s412_s1 = inlined_call_operand.vmem [shape: f32[32,1], index: 1, kind: input, shape index: {}]   ;;  %s413_s2 = inlined_call_operand.vmem [shape: f32[64,1], index: 2, kind: input, shape index: {}]   ;;  %s414_s3 = inlined_call_operand.hbm [shape: f32[1,1], index: 3, kind: output, shape index: {}]  }
   0x1   :  { %v23_v0 = vld [vmem:[%s412_s1] sm:$0xff]  ;;  %v24_v1 = vld [vmem:[%s412_s1 + $0x8] sm:$0xff]  ;;  %v25_v2 = vld [vmem:[%s412_s1 + $0x10] sm:$0xff] }
   0x2   :  { %v263_v3 = vpack.c.bf16 %v24_v1, %v23_v0  ;;  %v26_v4 = vld [vmem:[%s412_s1 + $0x18] sm:$0xff]  ;;  %v15_v5 = vld [vmem:[%s411_s0] sm:$0xff] }
   0x3   :  { %v267_v6 = vpack.c.bf16 %v26_v4, %v25_v2  ;;  %251 = vmatprep.mubr.msk.f32.mxu0 %vm27_vm0, %v15_v5  ;;  %v19_v7 = vld [vmem:[%s411_s0 + $0x20] sm:$0xff] }
   0x4   :  { %264 = vmatprep.subr.bf16.mxu0 %v263_v3  ;;  %271 = vmatprep.subr.bf16.mxu1 %v263_v3 }
   0x5   :  { %266 = vmatpush3.bf16.msra.mxu0 %v263_v3  ;;  %273 = vmatpush3.bf16.msra.mxu1 %v263_v3 }
   0x6   :  { %8 = vsyncpa [#allocation3], 0  ;;  %268 = vmatprep.subr.bf16.mxu0 %v267_v6  ;;  %272 = vmatprep.subr.bf16.mxu1 %v267_v6  ;;  %v16_v8 = vld [vmem:[%s411_s0 + $0x8] sm:$0xff]  ;;  %v17_v10 = vld [vmem:[%s411_s0 + $0x10] sm:$0xff]  ;;  %vm181_vm1 = vcmask 7168   ;;  %vm207_vm2 = vcmask 0  }
   0x7   :  { %257 = vmatprep.mubr.msk.f32.mxu1 %vm27_vm0, %v19_v7  ;;  %v20_v9 = vld [vmem:[%s411_s0 + $0x28] sm:$0xff]  ;;  %v21_v11 = vld [vmem:[%s411_s0 + $0x30] sm:$0xff]  ;;  %v18_v12 = vld [vmem:[%s411_s0 + $0x18] sm:$0xff] }
   0x8   :  { %v22_v13 = vld [vmem:[%s411_s0 + $0x38] sm:$0xff]  ;;  %v158_v14 = vld [vmem:[%s413_s2 + $0x8] sm:$0xff]  ;;  %v157_v15 = vld [vmem:[%s413_s2] sm:$0xff] }
   0x9   :  { %270 = vmatpush3.bf16.msra.mxu0 %v267_v6  ;;  %274 = vmatpush3.bf16.msra.mxu1 %v267_v6  ;;  %v161_v21 = vld [vmem:[%s413_s2 + $0x20] sm:$0xff]  ;;  %v160_v23 = vld [vmem:[%s413_s2 + $0x18] sm:$0xff]  ;;  %v159_v25 = vld [vmem:[%s413_s2 + $0x10] sm:$0xff] }
   0xa   :  { %v162_v28 = vld [vmem:[%s413_s2 + $0x28] sm:$0xff]  ;;  %v163_v35 = vld [vmem:[%s413_s2 + $0x30] sm:$0xff]  ;;  %v164_v44 = vld [vmem:[%s413_s2 + $0x38] sm:$0xff]  ;;  %s302_s2 = smov [#allocation2]  }
   0xb   :  { %s215_s23 = sshll.u32 %s302_s2, 4  ;;  %s216_s23 = int_to_ptr.vmem [resolvable:$true] %s215_s23 }
   0xc   :  { %252 = vmatmul.mubr.msk.f32.vlgmr.msra.gmra.mrb[0].mxu0 %vm27_vm0, %v16_v8  ;;  %258 = vmatmul.mubr.msk.f32.vlgmr.msra.gmra.mrb[0].mxu1 %vm27_vm0, %v20_v9  ;;  %s278_s24 = scalar_lea.vmem %s216_s23, 16  ;;  %s282_s25 = scalar_lea.vmem %s216_s23, 32 }
   0xd   :  { %254 = vmatprep.mubr.msk.f32.mxu0 %vm27_vm0, %v17_v10  ;;  %260 = vmatprep.mubr.msk.f32.mxu1 %vm27_vm0, %v21_v11  ;;  %p279_p0 = scmp.ne.s32.totalorder %s216_s23, %s278_s24  ;;  %p283_p1 = scmp.lt.s32.totalorder %s216_s23, %s216_s23 }
   0xe   :  { %p284_p2 = scmp.lt.s32.totalorder %s282_s25, %s278_s24 }
  0x10   :  { %255 = vmatmul.mubr.msk.f32.gmra.mrb[2].mxu0 %vm27_vm0, %v18_v12  ;;  %261 = vmatmul.mubr.msk.f32.gmra.mrb[2].mxu1 %vm27_vm0, %v22_v13  ;;  %p285_p3 = por %p284_p2, %p283_p1 }
  0x12   :  { %p286_p4 = pnand %p285_p3, %p279_p0 }
  0xdf   :  { %v253_v16 = vpop.f32.mrb[0].mxu0  ;;  %v259_v17 = vpop.f32.mrb[0].mxu1 }
  0xe0   :  { %v166_v18 = vsub.f32 %v253_v16, %v158_v14  ;;  %v118_v19 = vpop.f32.mrb[1].mxu0  ;;  %v138_v20 = vpop.f32.mrb[1].mxu1  ;;  %v170_v39 = vsub.f32 %v259_v17, %v162_v28 }
  0xe1   :  { %v165_v22 = vsub.f32 %v118_v19, %v157_v15  ;;  %v169_v29 = vsub.f32 %v138_v20, %v161_v21 }
  0xe2   :  { %v174_v24 = vmul.f32 %v166_v18, %v166_v18  ;;  %v178_v47 = vmul.f32 %v170_v39, %v170_v39 }
  0xe3   :  { %v173_v26 = vmul.f32 %v165_v22, %v165_v22  ;;  %v256_v27 = vpop.f32.mrb[2].mxu0  ;;  %v262_v30 = vpop.f32.mrb[2].mxu1  ;;  %v177_v42 = vmul.f32 %v169_v29, %v169_v29 }
  0xe4   :  { %v183_v31 = vsel %vm181_vm1, %v174_v24, 0.0  ;;  %v168_v32 = vsub.f32 %v256_v27, %v160_v23  ;;  %v128_v33 = vpop.f32.mrb[3].mxu0  ;;  %v148_v34 = vpop.f32.mrb[3].mxu1  ;;  %v172_v50 = vsub.f32 %v262_v30, %v164_v44  ;;  %v191_v54 = vsel %vm181_vm1, %v178_v47, 0.0 }
  0xe5   :  { %v182_v36 = vsel %vm181_vm1, %v173_v26, 0.0  ;;  %v167_v37 = vsub.f32 %v128_v33, %v159_v25  ;;  %v171_v43 = vsub.f32 %v148_v34, %v163_v35  ;;  %v189_v49 = vsel %vm181_vm1, %v177_v42, 0.0 }
  0xe6   :  { %v184_v38 = vadd.f32 %v183_v31, %v182_v36  ;;  %v176_v40 = vmul.f32 %v168_v32, %v168_v32  ;;  %v180_v55 = vmul.f32 %v172_v50, %v172_v50 }
  0xe7   :  { %v175_v41 = vmul.f32 %v167_v37, %v167_v37  ;;  %v179_v51 = vmul.f32 %v171_v43, %v171_v43 }
  0xe8   :  { %v187_v48 = vsel %vm181_vm1, %v176_v40, 0.0  ;;  %v195_v59 = vsel %vm181_vm1, %v180_v55, 0.0 }
  0xe9   :  { %v185_v45 = vsel %vm181_vm1, %v175_v41, 0.0  ;;  %v193_v56 = vsel %vm181_vm1, %v179_v51, 0.0 }
  0xea   :  { %v186_v46 = vadd.f32 %v185_v45, %v184_v38 }
  0xec   :  { %v188_v52 = vadd.f32 %v187_v48, %v186_v46 }
  0xee   :  { %v190_v53 = vadd.f32 %v189_v49, %v188_v52 }
  0xf0   :  { %v192_v57 = vadd.f32 %v191_v54, %v190_v53 }
  0xf2   :  { %v194_v58 = vadd.f32 %v193_v56, %v192_v57 }
  0xf4   :  { %v196_v60 = vadd.f32 %v195_v59, %v194_v58 }
  0xf6   :  { %197 = vadd.xlane.f32.xlu0 %v196_v60 }
 0x183   :  { %v198_v61 = vpop.xlane.xlu0 %197 }
 0x184   :  { %v199_v62 = vrot.slane %v198_v61, 4 }
 0x186   :  { %v200_v63 = vadd.f32 %v199_v62, %v198_v61 }
 0x188   :  { %v201_v0 = vrot.slane %v200_v63, 2 }
 0x18a   :  { %v202_v1 = vadd.f32 %v201_v0, %v200_v63 }
 0x18c   :  { %v203_v2 = vrot.slane %v202_v1, 1 }
 0x18e   :  { %v204_v3 = vadd.f32 %v203_v2, %v202_v1 }
 0x190   :  { %275 = vpush %v204_v3 }
 0x1c1   :  { %s276_s1 = spop %275 }
 0x1c2   :  { %v206_v4 = vstv %s276_s1 }
 0x1c3   :  { %208 = vst.msk [vmem:[#allocation2] sm:$0x1] %vm207_vm2, %v206_v4 }
 0x1c4   :  { %289 = shalt.err (!%p286_p4)
}
 0x1c5   :  { %s290_s28 = scalar_lea.hbm %s414_s3, 16 }
 0x1c6   :  { %p291_p5 = scmp.ne.s32.totalorder %s414_s3, %s290_s28  ;;  %p294_p6 = scmp.lt.u32.totalorder %s290_s28, %s414_s3 }
 0x1c8   :  { %p296_p7 = pnand %p294_p6, %p291_p5 }
 0x1ca   :  { %299 = shalt.err (!%p296_p7)
}
 0x1cb   :  { %218 = dma.vmem_to_hbm [thread:$0]  %s216_s23, 16, %s414_s3, [#allocation3]  }
 0x1cc   :  { %300 = dma.done.wait [#allocation3], 16  }
 0x1cd   :  { %301 = vsyncadd [#allocation3], 4294967280 }
 0x1ce   :  { %222 = vsyncpa [#allocation3], 1 }

</bundles_post_ra>
